<compile_context>
chip_gen: v7x
topology: tpu7x:2x2x1
jax: 0.10.0
libtpu: 0.0.40
codegen_flags: <defaults>
</compile_context>

<pallas_src>
import functools

import jax
import jax.numpy as jnp
from jax import lax
from jax.experimental import pallas as pl
from jax.experimental.pallas import tpu as pltpu

INPUT_SIZE = 2
HIDDEN_SIZE = 32
OUT_SIZE = 2


def _fire_lstm_kernel(x_ref, wih_ref, whh_ref, bias_ref, wfc_ref, bfc_ref, out_ref,
                      gx_scr, h_scr, c_scr,
                      *, t_total, t_blk, n_chains, needs_mask, unroll):
    """One (B_BLK) batch tile x one (T_BLK) time chunk of the LSTM recurrence.

    x_ref   : (T_BLK, B_BLK, I)  f32  raw inputs, time-major chunk
    wih_ref : (I, 4H)            f32  weight_ih_l0.T   (gate order [i,f,o,g])
    whh_ref : (H, 4H)            f32  weight_hh_l0.T   (gate order [i,f,o,g])
    bias_ref: (1, 4H)            f32  b_ih + b_hh      (gate order [i,f,o,g])
    wfc_ref : (H, 2)             f32  fc.weight.T
    bfc_ref : (1, 2)             f32  fc.bias
    out_ref : (B_BLK, 2)         f32  written only on the last T chunk
    gx_scr  : (T_BLK, B_BLK, 4H) f32  per-chunk input projection (VMEM)
    h_scr/c_scr : (B_BLK, H)     f32  recurrent state, persists across T chunks
    """
    H = HIDDEN_SIZE
    G = 4 * H
    tchunk = pl.program_id(1)

    @pl.when(tchunk == 0)
    def _():
        h_scr[...] = jnp.zeros_like(h_scr)
        c_scr[...] = jnp.zeros_like(c_scr)

    # ---- fused input projection (h-independent, off the serial path) ----
    # gx[t, b, :] = bias + sum_i x[t, b, i] * W_ih.T[i, :]   (VPU broadcast-mults,
    # no K=2 MXU matmul).
    x = x_ref[...]                                            # (T_BLK, B_BLK, I)
    wih = wih_ref[...]                                        # (I, 4H)
    gx = bias_ref[...].reshape(1, 1, G)
    for i in range(x.shape[-1]):
        gx = gx + x[:, :, i:i + 1] * wih[i, :].reshape(1, 1, G)
    gx_scr[...] = gx

    # Loop-invariant recurrent weight, hoisted out of the serial loop.
    whh = whh_ref[...]                                        # (H, 4H)

    b_blk = h_scr.shape[0]
    b_sub = b_blk // n_chains

    # h/c live as loop-carried vregs; scratch only touched at chunk edges.
    carry0 = []
    for ci in range(n_chains):
        carry0.append(h_scr[ci * b_sub:(ci + 1) * b_sub, :])
        carry0.append(c_scr[ci * b_sub:(ci + 1) * b_sub, :])

    def step(s, carry):
        gx_s = gx_scr[s]                                      # (B_BLK, 4H)
        if needs_mask:
            pred = (tchunk * t_blk + s) < t_total
        new = []
        # n_chains independent recurrences interleaved to hide MXU/EUP latency.
        for ci in range(n_chains):
            h = carry[2 * ci]
            c = carry[2 * ci + 1]
            g = gx_s[ci * b_sub:(ci + 1) * b_sub, :] + jnp.dot(
                h, whh, preferred_element_type=jnp.float32)   # (b_sub, 4H)
            sig = jax.nn.sigmoid(g[:, :3 * H])                # [i | f | o]
            g_g = jnp.tanh(g[:, 3 * H:])                      # [g]
            i_g = sig[:, 0 * H:1 * H]
            f_g = sig[:, 1 * H:2 * H]
            o_g = sig[:, 2 * H:3 * H]
            c_new = f_g * c + i_g * g_g
            h_new = o_g * jnp.tanh(c_new)
            if needs_mask:
                h_new = jnp.where(pred, h_new, h)
                c_new = jnp.where(pred, c_new, c)
            new.append(h_new)
            new.append(c_new)
        return tuple(new)

    carry = lax.fori_loop(0, t_blk, step, tuple(carry0), unroll=unroll)

    for ci in range(n_chains):
        h_scr[ci * b_sub:(ci + 1) * b_sub, :] = carry[2 * ci]
        c_scr[ci * b_sub:(ci + 1) * b_sub, :] = carry[2 * ci + 1]

    # Final FC on the last hidden state, only at the last T chunk.
    @pl.when(tchunk == pl.num_programs(1) - 1)
    def _():
        out_ref[...] = (
            jnp.dot(h_scr[...], wfc_ref[...], preferred_element_type=jnp.float32)
            + bfc_ref[...]
        )


def fire_lstm_forward(x, params, *, num_b_tiles=1, t_blk=None):
    """x: (B, T, I) float32 -> (B, 2) float32.

    num_b_tiles: batch tiles for the "parallel" grid axis.  Use 1 on single-TC
      chips (v5e/v6e); 2 on v7x so both TensorCores get work.
    t_blk: optional override of the time-chunk length (default: VMEM-budgeted).
    """
    B, T, I = x.shape
    H = HIDDEN_SIZE
    G = 4 * H

    # --- gate reorder [i, f, g, o] -> [i, f, o, g] (contiguous sigmoid block) ---
    perm = jnp.concatenate([jnp.arange(0, H), jnp.arange(H, 2 * H),
                            jnp.arange(3 * H, 4 * H), jnp.arange(2 * H, 3 * H)])
    w_ih = params["w_ih"].astype(jnp.float32)[perm]           # (4H, I)
    w_hh = params["w_hh"].astype(jnp.float32)[perm]           # (4H, H)
    bias = (params["b_ih"] + params["b_hh"]).astype(jnp.float32)[perm]

    wih_k = w_ih.T                                            # (I, 4H)
    whh_k = w_hh.T                                            # (H, 4H)
    bias_k = bias.reshape(1, G)
    wfc_k = params["w_fc"].T.astype(jnp.float32)              # (H, 2)
    bfc_k = params["b_fc"].reshape(1, OUT_SIZE).astype(jnp.float32)

    # --- batch tiling: sublane-aligned, few fat tiles ---
    num_b = max(1, int(num_b_tiles))
    B_BLK = -(-max(B, 1) // num_b)
    B_BLK = ((B_BLK + 7) // 8) * 8
    B_pad = B_BLK * num_b

    # Two interleaved recurrence chains when the tile splits on a sublane boundary.
    n_chains = 2 if (B_BLK >= 16 and B_BLK % 16 == 0) else 1

    # --- time chunking: (gx scratch + double-buffered x block) ~<= 10 MiB ---
    bytes_per_step = 3 * B_BLK * G * 4
    if t_blk is None:
        T_BLK = max(1, min(T, (10 << 20) // bytes_per_step))
    else:
        T_BLK = max(1, min(int(t_blk), T))
    T_pad = ((T + T_BLK - 1) // T_BLK) * T_BLK
    num_t = T_pad // T_BLK
    needs_mask = (T % T_BLK) != 0
    unroll = max(u for u in (1, 2, 4, 8) if T_BLK % u == 0)

    # Time-major, padded input for the kernel.
    x_tm = jnp.transpose(x.astype(jnp.float32), (1, 0, 2))    # (T, B, I)
    x_tm = jnp.pad(x_tm, ((0, T_pad - T), (0, B_pad - B), (0, 0)))

    kernel = functools.partial(_fire_lstm_kernel, t_total=T, t_blk=T_BLK,
                               n_chains=n_chains, needs_mask=needs_mask,
                               unroll=unroll)

    out = pl.pallas_call(
        kernel,
        out_shape=jax.ShapeDtypeStruct((B_pad, OUT_SIZE), jnp.float32),
        grid_spec=pltpu.PrefetchScalarGridSpec(
            num_scalar_prefetch=0,
            grid=(num_b, num_t),
            in_specs=[
                pl.BlockSpec((T_BLK, B_BLK, I), lambda b, t: (t, b, 0)),
                pl.BlockSpec((I, G), lambda b, t: (0, 0)),
                pl.BlockSpec((H, G), lambda b, t: (0, 0)),
                pl.BlockSpec((1, G), lambda b, t: (0, 0)),
                pl.BlockSpec((H, OUT_SIZE), lambda b, t: (0, 0)),
                pl.BlockSpec((1, OUT_SIZE), lambda b, t: (0, 0)),
            ],
            out_specs=pl.BlockSpec((B_BLK, OUT_SIZE), lambda b, t: (b, 0)),
            scratch_shapes=[
                pltpu.VMEM((T_BLK, B_BLK, G), jnp.float32),   # gx (per chunk)
                pltpu.VMEM((B_BLK, H), jnp.float32),          # h
                pltpu.VMEM((B_BLK, H), jnp.float32),          # c
            ],
        ),
        compiler_params=pltpu.CompilerParams(
            dimension_semantics=("parallel", "arbitrary"),
        ),
    )(x_tm, wih_k, whh_k, bias_k, wfc_k, bfc_k)
    return out[:B]


def init_params(key):
    """Deterministic parameter init matching PyTorch LSTM/Linear shapes."""
    H, I = HIDDEN_SIZE, INPUT_SIZE
    k = 1.0 / jnp.sqrt(jnp.float32(H))
    keys = jax.random.split(key, 6)
    u = lambda kk, shape, bound: jax.random.uniform(
        kk, shape, jnp.float32, -bound, bound)
    return {
        "w_ih": u(keys[0], (4 * H, I), k),     # gate order [i, f, g, o]
        "w_hh": u(keys[1], (4 * H, H), k),
        "b_ih": u(keys[2], (4 * H,), k),
        "b_hh": u(keys[3], (4 * H,), k),
        "w_fc": u(keys[4], (OUT_SIZE, H), k),
        "b_fc": u(keys[5], (OUT_SIZE,), k),
    }


def fire_lstm_reference(x, params):
    """Pure-JAX reference mirroring torch.nn.LSTM + Linear semantics."""
    H = HIDDEN_SIZE
    B = x.shape[0]
    w_ih, w_hh = params["w_ih"], params["w_hh"]
    b = params["b_ih"] + params["b_hh"]

    def cell(carry, xt):
        h, c = carry
        gates = xt @ w_ih.T + h @ w_hh.T + b
        i = jax.nn.sigmoid(gates[:, 0 * H:1 * H])
        f = jax.nn.sigmoid(gates[:, 1 * H:2 * H])
        g = jnp.tanh(gates[:, 2 * H:3 * H])
        o = jax.nn.sigmoid(gates[:, 3 * H:4 * H])
        c = f * c + i * g
        h = o * jnp.tanh(c)
        return (h, c), h

    h0 = jnp.zeros((B, H), jnp.float32)
    c0 = jnp.zeros((B, H), jnp.float32)
    (h_last, _), _ = lax.scan(cell, (h0, c0), jnp.transpose(x, (1, 0, 2)))
    return h_last @ params["w_fc"].T + params["b_fc"]


if __name__ == "__main__":
    key = jax.random.PRNGKey(0)
    k_x, k_x2, k_p = jax.random.split(key, 3)
    params = init_params(k_p)

    # Config matching the module defaults (batch=2, seq=8, input=2).
    B, T = 2, 8
    x = jax.random.normal(k_x, (B, T, INPUT_SIZE), dtype=jnp.float32)
    out = jax.block_until_ready(fire_lstm_forward(x, params))
    ref = fire_lstm_reference(x, params)
    assert out.shape == (B, OUT_SIZE)
    assert jnp.allclose(out, ref, atol=1e-5, rtol=1e-5), (out, ref)

    # Second config: exercises 2 batch tiles, interleaved chains, T chunking
    # with a non-dividing T (masked remainder steps).
    B2, T2 = 32, 13
    x2 = jax.random.normal(k_x2, (B2, T2, INPUT_SIZE), dtype=jnp.float32)
    out2 = jax.block_until_ready(
        fire_lstm_forward(x2, params, num_b_tiles=2, t_blk=5))
    ref2 = fire_lstm_reference(x2, params)
    assert jnp.allclose(out2, ref2, atol=1e-5, rtol=1e-5), (out2, ref2)

    print("KERNEL_OK")
</pallas_src>

<mosaic_0001>
module attributes {stable_mosaic.version = 11 : i64} {
  func.func @_fire_lstm_kernel(%arg0: i32, %arg1: i32, %arg2: memref<8x8x2xf32, #tpu.memory_space<vmem>>, %arg3: memref<2x128xf32, #tpu.memory_space<vmem>>, %arg4: memref<32x128xf32, #tpu.memory_space<vmem>>, %arg5: memref<1x128xf32, #tpu.memory_space<vmem>>, %arg6: memref<32x2xf32, #tpu.memory_space<vmem>>, %arg7: memref<1x2xf32, #tpu.memory_space<vmem>>, %arg8: memref<8x2xf32, #tpu.memory_space<vmem>>, %arg9: memref<8x8x128xf32, #tpu.memory_space<vmem>>, %arg10: memref<8x32xf32, #tpu.memory_space<vmem>>, %arg11: memref<8x32xf32, #tpu.memory_space<vmem>>) attributes {dimension_semantics = [#tpu.dimension_semantics<parallel>, #tpu.dimension_semantics<arbitrary>], iteration_bounds = array<i64: 1, 1>, scalar_prefetch = 0 : i64, scratch_operands = 3 : i64, tpu.core_type = #tpu.core_type<tc>, window_params = [{transform_indices = @transform_0, window_bounds = array<i64: 8, 8, 2>}, {pipeline_mode = #tpu.pipeline_mode<synchronous>, transform_indices = @transform_1, window_bounds = array<i64: 2, 128>}, {pipeline_mode = #tpu.pipeline_mode<synchronous>, transform_indices = @transform_2, window_bounds = array<i64: 32, 128>}, {pipeline_mode = #tpu.pipeline_mode<synchronous>, transform_indices = @transform_3, window_bounds = array<i64: 1, 128>}, {pipeline_mode = #tpu.pipeline_mode<synchronous>, transform_indices = @transform_4, window_bounds = array<i64: 32, 2>}, {pipeline_mode = #tpu.pipeline_mode<synchronous>, transform_indices = @transform_5, window_bounds = array<i64: 1, 2>}, {transform_indices = @transform_6, window_bounds = array<i64: 8, 2>}]} {
    %c0_i32 = arith.constant 0 : i32
    %0 = arith.cmpi eq, %arg1, %c0_i32 : i32
    %1 = arith.extui %0 : i1 to i32
    %c0_i32_0 = arith.constant 0 : i32
    %2 = arith.cmpi ne, %1, %c0_i32_0 : i32
    scf.if %2 {
      %cst_54 = arith.constant 0.000000e+00 : f32
      %201 = vector.broadcast %cst_54 : f32 to vector<8x32xf32>
      %c0_55 = arith.constant 0 : index
      %c0_56 = arith.constant 0 : index
      %202 = vector.load %arg10[%c0_55, %c0_56] : memref<8x32xf32, #tpu.memory_space<vmem>>, vector<8x32xf32>
      tpu.vector_store %arg10[%c0_55, %c0_56], %201 {strides = array<i32>} : memref<8x32xf32, #tpu.memory_space<vmem>>, vector<8x32xf32>,
      %cst_57 = arith.constant 0.000000e+00 : f32
      %203 = vector.broadcast %cst_57 : f32 to vector<8x32xf32>
      %c0_58 = arith.constant 0 : index
      %c0_59 = arith.constant 0 : index
      %204 = vector.load %arg11[%c0_58, %c0_59] : memref<8x32xf32, #tpu.memory_space<vmem>>, vector<8x32xf32>
      tpu.vector_store %arg11[%c0_58, %c0_59], %203 {strides = array<i32>} : memref<8x32xf32, #tpu.memory_space<vmem>>, vector<8x32xf32>,
    } else {
    }
    %c0 = arith.constant 0 : index
    %c0_1 = arith.constant 0 : index
    %c0_2 = arith.constant 0 : index
    %3 = vector.load %arg2[%c0, %c0_1, %c0_2] : memref<8x8x2xf32, #tpu.memory_space<vmem>>, vector<8x8x2xf32>
    %c0_3 = arith.constant 0 : index
    %c0_4 = arith.constant 0 : index
    %4 = vector.load %arg3[%c0_3, %c0_4] : memref<2x128xf32, #tpu.memory_space<vmem>>, vector<2x128xf32>
    %c0_5 = arith.constant 0 : index
    %c0_6 = arith.constant 0 : index
    %5 = vector.load %arg5[%c0_5, %c0_6] : memref<1x128xf32, #tpu.memory_space<vmem>>, vector<1x128xf32>
    %6 = vector.shape_cast %5 : vector<1x128xf32> to vector<1x1x128xf32>
    %7 = vector.extract_strided_slice %3 {offsets = [0, 0, 0], sizes = [8, 8, 1], strides = [1, 1, 1]} : vector<8x8x2xf32> to vector<8x8x1xf32>
    %8 = vector.extract_strided_slice %4 {offsets = [0, 0], sizes = [1, 128], strides = [1, 1]} : vector<2x128xf32> to vector<1x128xf32>
    %9 = vector.shape_cast %8 : vector<1x128xf32> to vector<128xf32>
    %10 = vector.shape_cast %9 : vector<128xf32> to vector<1x1x128xf32>
    %11 = vector.broadcast %7 : vector<8x8x1xf32> to vector<8x8x128xf32>
    %12 = vector.broadcast %10 : vector<1x1x128xf32> to vector<8x8x128xf32>
    %13 = arith.mulf %11, %12 : vector<8x8x128xf32>
    %14 = vector.broadcast %6 : vector<1x1x128xf32> to vector<8x8x128xf32>
    %15 = arith.addf %14, %13 : vector<8x8x128xf32>
    %16 = vector.extract_strided_slice %3 {offsets = [0, 0, 1], sizes = [8, 8, 1], strides = [1, 1, 1]} : vector<8x8x2xf32> to vector<8x8x1xf32>
    %17 = vector.extract_strided_slice %4 {offsets = [1, 0], sizes = [1, 128], strides = [1, 1]} : vector<2x128xf32> to vector<1x128xf32>
    %18 = vector.shape_cast %17 : vector<1x128xf32> to vector<128xf32>
    %19 = vector.shape_cast %18 : vector<128xf32> to vector<1x1x128xf32>
    %20 = vector.broadcast %16 : vector<8x8x1xf32> to vector<8x8x128xf32>
    %21 = vector.broadcast %19 : vector<1x1x128xf32> to vector<8x8x128xf32>
    %22 = arith.mulf %20, %21 : vector<8x8x128xf32>
    %23 = arith.addf %15, %22 : vector<8x8x128xf32>
    %c0_7 = arith.constant 0 : index
    %c0_8 = arith.constant 0 : index
    %c0_9 = arith.constant 0 : index
    %24 = vector.load %arg9[%c0_7, %c0_8, %c0_9] : memref<8x8x128xf32, #tpu.memory_space<vmem>>, vector<8x8x128xf32>
    tpu.vector_store %arg9[%c0_7, %c0_8, %c0_9], %23 {strides = array<i32>} : memref<8x8x128xf32, #tpu.memory_space<vmem>>, vector<8x8x128xf32>,
    %c0_10 = arith.constant 0 : index
    %c0_11 = arith.constant 0 : index
    %25 = vector.load %arg4[%c0_10, %c0_11] : memref<32x128xf32, #tpu.memory_space<vmem>>, vector<32x128xf32>
    %c0_12 = arith.constant 0 : index
    %c0_13 = arith.constant 0 : index
    %26 = vector.load %arg10[%c0_12, %c0_13] : memref<8x32xf32, #tpu.memory_space<vmem>>, vector<8x32xf32>
    %c0_14 = arith.constant 0 : index
    %c0_15 = arith.constant 0 : index
    %27 = vector.load %arg11[%c0_14, %c0_15] : memref<8x32xf32, #tpu.memory_space<vmem>>, vector<8x32xf32>
    %c0_i32_16 = arith.constant 0 : i32
    %28 = arith.index_cast %c0_i32_16 : i32 to index
    %c0_17 = arith.constant 0 : index
    %c0_18 = arith.constant 0 : index
    %29 = vector.load %arg9[%28, %c0_17, %c0_18] : memref<8x8x128xf32, #tpu.memory_space<vmem>>, vector<1x8x128xf32>
    %30 = vector.shape_cast %29 : vector<1x8x128xf32> to vector<8x128xf32>
    %cst = arith.constant dense<0.000000e+00> : vector<8x128xf32>
    %31 = tpu.matmul %26, %25, %cst {dimension_numbers = #tpu.dot_dimension_numbers<[1], [0], [0], [1], [0, 0, 1, 1], [], []>} : vector<8x32xf32>, vector<32x128xf32>, vector<8x128xf32> -> vector<8x128xf32>
    %32 = arith.addf %30, %31 : vector<8x128xf32>
    %33 = vector.extract_strided_slice %32 {offsets = [0, 0], sizes = [8, 96], strides = [1, 1]} : vector<8x128xf32> to vector<8x96xf32>
    %34 = arith.negf %33 : vector<8x96xf32>
    %35 = math.exp %34 : vector<8x96xf32>
    %cst_19 = arith.constant 1.000000e+00 : f32
    %36 = vector.broadcast %cst_19 : f32 to vector<8x96xf32>
    %37 = arith.addf %36, %35 : vector<8x96xf32>
    %38 = arith.divf %36, %37 : vector<8x96xf32>
    %39 = vector.extract_strided_slice %32 {offsets = [0, 96], sizes = [8, 32], strides = [1, 1]} : vector<8x128xf32> to vector<8x32xf32>
    %40 = math.tanh %39 : vector<8x32xf32>
    %41 = vector.extract_strided_slice %38 {offsets = [0, 0], sizes = [8, 32], strides = [1, 1]} : vector<8x96xf32> to vector<8x32xf32>
    %42 = vector.extract_strided_slice %38 {offsets = [0, 32], sizes = [8, 32], strides = [1, 1]} : vector<8x96xf32> to vector<8x32xf32>
    %43 = vector.extract_strided_slice %38 {offsets = [0, 64], sizes = [8, 32], strides = [1, 1]} : vector<8x96xf32> to vector<8x32xf32>
    %44 = arith.mulf %42, %27 : vector<8x32xf32>
    %45 = arith.mulf %41, %40 : vector<8x32xf32>
    %46 = arith.addf %44, %45 : vector<8x32xf32>
    %47 = math.tanh %46 : vector<8x32xf32>
    %48 = arith.mulf %43, %47 : vector<8x32xf32>
    %c1_i32 = arith.constant 1 : i32
    %49 = arith.index_cast %c1_i32 : i32 to index
    %c0_20 = arith.constant 0 : index
    %c0_21 = arith.constant 0 : index
    %50 = vector.load %arg9[%49, %c0_20, %c0_21] : memref<8x8x128xf32, #tpu.memory_space<vmem>>, vector<1x8x128xf32>
    %51 = vector.shape_cast %50 : vector<1x8x128xf32> to vector<8x128xf32>
    %cst_22 = arith.constant dense<0.000000e+00> : vector<8x128xf32>
    %52 = tpu.matmul %48, %25, %cst_22 {dimension_numbers = #tpu.dot_dimension_numbers<[1], [0], [0], [1], [0, 0, 1, 1], [], []>} : vector<8x32xf32>, vector<32x128xf32>, vector<8x128xf32> -> vector<8x128xf32>
    %53 = arith.addf %51, %52 : vector<8x128xf32>
    %54 = vector.extract_strided_slice %53 {offsets = [0, 0], sizes = [8, 96], strides = [1, 1]} : vector<8x128xf32> to vector<8x96xf32>
    %55 = arith.negf %54 : vector<8x96xf32>
    %56 = math.exp %55 : vector<8x96xf32>
    %cst_23 = arith.constant 1.000000e+00 : f32
    %57 = vector.broadcast %cst_23 : f32 to vector<8x96xf32>
    %58 = arith.addf %57, %56 : vector<8x96xf32>
    %59 = arith.divf %57, %58 : vector<8x96xf32>
    %60 = vector.extract_strided_slice %53 {offsets = [0, 96], sizes = [8, 32], strides = [1, 1]} : vector<8x128xf32> to vector<8x32xf32>
    %61 = math.tanh %60 : vector<8x32xf32>
    %62 = vector.extract_strided_slice %59 {offsets = [0, 0], sizes = [8, 32], strides = [1, 1]} : vector<8x96xf32> to vector<8x32xf32>
    %63 = vector.extract_strided_slice %59 {offsets = [0, 32], sizes = [8, 32], strides = [1, 1]} : vector<8x96xf32> to vector<8x32xf32>
    %64 = vector.extract_strided_slice %59 {offsets = [0, 64], sizes = [8, 32], strides = [1, 1]} : vector<8x96xf32> to vector<8x32xf32>
    %65 = arith.mulf %63, %46 : vector<8x32xf32>
    %66 = arith.mulf %62, %61 : vector<8x32xf32>
    %67 = arith.addf %65, %66 : vector<8x32xf32>
    %68 = math.tanh %67 : vector<8x32xf32>
    %69 = arith.mulf %64, %68 : vector<8x32xf32>
    %c2_i32 = arith.constant 2 : i32
    %70 = arith.index_cast %c2_i32 : i32 to index
    %c0_24 = arith.constant 0 : index
    %c0_25 = arith.constant 0 : index
    %71 = vector.load %arg9[%70, %c0_24, %c0_25] : memref<8x8x128xf32, #tpu.memory_space<vmem>>, vector<1x8x128xf32>
    %72 = vector.shape_cast %71 : vector<1x8x128xf32> to vector<8x128xf32>
    %cst_26 = arith.constant dense<0.000000e+00> : vector<8x128xf32>
    %73 = tpu.matmul %69, %25, %cst_26 {dimension_numbers = #tpu.dot_dimension_numbers<[1], [0], [0], [1], [0, 0, 1, 1], [], []>} : vector<8x32xf32>, vector<32x128xf32>, vector<8x128xf32> -> vector<8x128xf32>
    %74 = arith.addf %72, %73 : vector<8x128xf32>
    %75 = vector.extract_strided_slice %74 {offsets = [0, 0], sizes = [8, 96], strides = [1, 1]} : vector<8x128xf32> to vector<8x96xf32>
    %76 = arith.negf %75 : vector<8x96xf32>
    %77 = math.exp %76 : vector<8x96xf32>
    %cst_27 = arith.constant 1.000000e+00 : f32
    %78 = vector.broadcast %cst_27 : f32 to vector<8x96xf32>
    %79 = arith.addf %78, %77 : vector<8x96xf32>
    %80 = arith.divf %78, %79 : vector<8x96xf32>
    %81 = vector.extract_strided_slice %74 {offsets = [0, 96], sizes = [8, 32], strides = [1, 1]} : vector<8x128xf32> to vector<8x32xf32>
    %82 = math.tanh %81 : vector<8x32xf32>
    %83 = vector.extract_strided_slice %80 {offsets = [0, 0], sizes = [8, 32], strides = [1, 1]} : vector<8x96xf32> to vector<8x32xf32>
    %84 = vector.extract_strided_slice %80 {offsets = [0, 32], sizes = [8, 32], strides = [1, 1]} : vector<8x96xf32> to vector<8x32xf32>
    %85 = vector.extract_strided_slice %80 {offsets = [0, 64], sizes = [8, 32], strides = [1, 1]} : vector<8x96xf32> to vector<8x32xf32>
    %86 = arith.mulf %84, %67 : vector<8x32xf32>
    %87 = arith.mulf %83, %82 : vector<8x32xf32>
    %88 = arith.addf %86, %87 : vector<8x32xf32>
    %89 = math.tanh %88 : vector<8x32xf32>
    %90 = arith.mulf %85, %89 : vector<8x32xf32>
    %c3_i32 = arith.constant 3 : i32
    %91 = arith.index_cast %c3_i32 : i32 to index
    %c0_28 = arith.constant 0 : index
    %c0_29 = arith.constant 0 : index
    %92 = vector.load %arg9[%91, %c0_28, %c0_29] : memref<8x8x128xf32, #tpu.memory_space<vmem>>, vector<1x8x128xf32>
    %93 = vector.shape_cast %92 : vector<1x8x128xf32> to vector<8x128xf32>
    %cst_30 = arith.constant dense<0.000000e+00> : vector<8x128xf32>
    %94 = tpu.matmul %90, %25, %cst_30 {dimension_numbers = #tpu.dot_dimension_numbers<[1], [0], [0], [1], [0, 0, 1, 1], [], []>} : vector<8x32xf32>, vector<32x128xf32>, vector<8x128xf32> -> vector<8x128xf32>
    %95 = arith.addf %93, %94 : vector<8x128xf32>
    %96 = vector.extract_strided_slice %95 {offsets = [0, 0], sizes = [8, 96], strides = [1, 1]} : vector<8x128xf32> to vector<8x96xf32>
    %97 = arith.negf %96 : vector<8x96xf32>
    %98 = math.exp %97 : vector<8x96xf32>
    %cst_31 = arith.constant 1.000000e+00 : f32
    %99 = vector.broadcast %cst_31 : f32 to vector<8x96xf32>
    %100 = arith.addf %99, %98 : vector<8x96xf32>
    %101 = arith.divf %99, %100 : vector<8x96xf32>
    %102 = vector.extract_strided_slice %95 {offsets = [0, 96], sizes = [8, 32], strides = [1, 1]} : vector<8x128xf32> to vector<8x32xf32>
    %103 = math.tanh %102 : vector<8x32xf32>
    %104 = vector.extract_strided_slice %101 {offsets = [0, 0], sizes = [8, 32], strides = [1, 1]} : vector<8x96xf32> to vector<8x32xf32>
    %105 = vector.extract_strided_slice %101 {offsets = [0, 32], sizes = [8, 32], strides = [1, 1]} : vector<8x96xf32> to vector<8x32xf32>
    %106 = vector.extract_strided_slice %101 {offsets = [0, 64], sizes = [8, 32], strides = [1, 1]} : vector<8x96xf32> to vector<8x32xf32>
    %107 = arith.mulf %105, %88 : vector<8x32xf32>
    %108 = arith.mulf %104, %103 : vector<8x32xf32>
    %109 = arith.addf %107, %108 : vector<8x32xf32>
    %110 = math.tanh %109 : vector<8x32xf32>
    %111 = arith.mulf %106, %110 : vector<8x32xf32>
    %c4_i32 = arith.constant 4 : i32
    %112 = arith.index_cast %c4_i32 : i32 to index
    %c0_32 = arith.constant 0 : index
    %c0_33 = arith.constant 0 : index
    %113 = vector.load %arg9[%112, %c0_32, %c0_33] : memref<8x8x128xf32, #tpu.memory_space<vmem>>, vector<1x8x128xf32>
    %114 = vector.shape_cast %113 : vector<1x8x128xf32> to vector<8x128xf32>
    %cst_34 = arith.constant dense<0.000000e+00> : vector<8x128xf32>
    %115 = tpu.matmul %111, %25, %cst_34 {dimension_numbers = #tpu.dot_dimension_numbers<[1], [0], [0], [1], [0, 0, 1, 1], [], []>} : vector<8x32xf32>, vector<32x128xf32>, vector<8x128xf32> -> vector<8x128xf32>
    %116 = arith.addf %114, %115 : vector<8x128xf32>
    %117 = vector.extract_strided_slice %116 {offsets = [0, 0], sizes = [8, 96], strides = [1, 1]} : vector<8x128xf32> to vector<8x96xf32>
    %118 = arith.negf %117 : vector<8x96xf32>
    %119 = math.exp %118 : vector<8x96xf32>
    %cst_35 = arith.constant 1.000000e+00 : f32
    %120 = vector.broadcast %cst_35 : f32 to vector<8x96xf32>
    %121 = arith.addf %120, %119 : vector<8x96xf32>
    %122 = arith.divf %120, %121 : vector<8x96xf32>
    %123 = vector.extract_strided_slice %116 {offsets = [0, 96], sizes = [8, 32], strides = [1, 1]} : vector<8x128xf32> to vector<8x32xf32>
    %124 = math.tanh %123 : vector<8x32xf32>
    %125 = vector.extract_strided_slice %122 {offsets = [0, 0], sizes = [8, 32], strides = [1, 1]} : vector<8x96xf32> to vector<8x32xf32>
    %126 = vector.extract_strided_slice %122 {offsets = [0, 32], sizes = [8, 32], strides = [1, 1]} : vector<8x96xf32> to vector<8x32xf32>
    %127 = vector.extract_strided_slice %122 {offsets = [0, 64], sizes = [8, 32], strides = [1, 1]} : vector<8x96xf32> to vector<8x32xf32>
    %128 = arith.mulf %126, %109 : vector<8x32xf32>
    %129 = arith.mulf %125, %124 : vector<8x32xf32>
    %130 = arith.addf %128, %129 : vector<8x32xf32>
    %131 = math.tanh %130 : vector<8x32xf32>
    %132 = arith.mulf %127, %131 : vector<8x32xf32>
    %c5_i32 = arith.constant 5 : i32
    %133 = arith.index_cast %c5_i32 : i32 to index
    %c0_36 = arith.constant 0 : index
    %c0_37 = arith.constant 0 : index
    %134 = vector.load %arg9[%133, %c0_36, %c0_37] : memref<8x8x128xf32, #tpu.memory_space<vmem>>, vector<1x8x128xf32>
    %135 = vector.shape_cast %134 : vector<1x8x128xf32> to vector<8x128xf32>
    %cst_38 = arith.constant dense<0.000000e+00> : vector<8x128xf32>
    %136 = tpu.matmul %132, %25, %cst_38 {dimension_numbers = #tpu.dot_dimension_numbers<[1], [0], [0], [1], [0, 0, 1, 1], [], []>} : vector<8x32xf32>, vector<32x128xf32>, vector<8x128xf32> -> vector<8x128xf32>
    %137 = arith.addf %135, %136 : vector<8x128xf32>
    %138 = vector.extract_strided_slice %137 {offsets = [0, 0], sizes = [8, 96], strides = [1, 1]} : vector<8x128xf32> to vector<8x96xf32>
    %139 = arith.negf %138 : vector<8x96xf32>
    %140 = math.exp %139 : vector<8x96xf32>
    %cst_39 = arith.constant 1.000000e+00 : f32
    %141 = vector.broadcast %cst_39 : f32 to vector<8x96xf32>
    %142 = arith.addf %141, %140 : vector<8x96xf32>
    %143 = arith.divf %141, %142 : vector<8x96xf32>
    %144 = vector.extract_strided_slice %137 {offsets = [0, 96], sizes = [8, 32], strides = [1, 1]} : vector<8x128xf32> to vector<8x32xf32>
    %145 = math.tanh %144 : vector<8x32xf32>
    %146 = vector.extract_strided_slice %143 {offsets = [0, 0], sizes = [8, 32], strides = [1, 1]} : vector<8x96xf32> to vector<8x32xf32>
    %147 = vector.extract_strided_slice %143 {offsets = [0, 32], sizes = [8, 32], strides = [1, 1]} : vector<8x96xf32> to vector<8x32xf32>
    %148 = vector.extract_strided_slice %143 {offsets = [0, 64], sizes = [8, 32], strides = [1, 1]} : vector<8x96xf32> to vector<8x32xf32>
    %149 = arith.mulf %147, %130 : vector<8x32xf32>
    %150 = arith.mulf %146, %145 : vector<8x32xf32>
    %151 = arith.addf %149, %150 : vector<8x32xf32>
    %152 = math.tanh %151 : vector<8x32xf32>
    %153 = arith.mulf %148, %152 : vector<8x32xf32>
    %c6_i32 = arith.constant 6 : i32
    %154 = arith.index_cast %c6_i32 : i32 to index
    %c0_40 = arith.constant 0 : index
    %c0_41 = arith.constant 0 : index
    %155 = vector.load %arg9[%154, %c0_40, %c0_41] : memref<8x8x128xf32, #tpu.memory_space<vmem>>, vector<1x8x128xf32>
    %156 = vector.shape_cast %155 : vector<1x8x128xf32> to vector<8x128xf32>
    %cst_42 = arith.constant dense<0.000000e+00> : vector<8x128xf32>
    %157 = tpu.matmul %153, %25, %cst_42 {dimension_numbers = #tpu.dot_dimension_numbers<[1], [0], [0], [1], [0, 0, 1, 1], [], []>} : vector<8x32xf32>, vector<32x128xf32>, vector<8x128xf32> -> vector<8x128xf32>
    %158 = arith.addf %156, %157 : vector<8x128xf32>
    %159 = vector.extract_strided_slice %158 {offsets = [0, 0], sizes = [8, 96], strides = [1, 1]} : vector<8x128xf32> to vector<8x96xf32>
    %160 = arith.negf %159 : vector<8x96xf32>
    %161 = math.exp %160 : vector<8x96xf32>
    %cst_43 = arith.constant 1.000000e+00 : f32
    %162 = vector.broadcast %cst_43 : f32 to vector<8x96xf32>
    %163 = arith.addf %162, %161 : vector<8x96xf32>
    %164 = arith.divf %162, %163 : vector<8x96xf32>
    %165 = vector.extract_strided_slice %158 {offsets = [0, 96], sizes = [8, 32], strides = [1, 1]} : vector<8x128xf32> to vector<8x32xf32>
    %166 = math.tanh %165 : vector<8x32xf32>
    %167 = vector.extract_strided_slice %164 {offsets = [0, 0], sizes = [8, 32], strides = [1, 1]} : vector<8x96xf32> to vector<8x32xf32>
    %168 = vector.extract_strided_slice %164 {offsets = [0, 32], sizes = [8, 32], strides = [1, 1]} : vector<8x96xf32> to vector<8x32xf32>
    %169 = vector.extract_strided_slice %164 {offsets = [0, 64], sizes = [8, 32], strides = [1, 1]} : vector<8x96xf32> to vector<8x32xf32>
    %170 = arith.mulf %168, %151 : vector<8x32xf32>
    %171 = arith.mulf %167, %166 : vector<8x32xf32>
    %172 = arith.addf %170, %171 : vector<8x32xf32>
    %173 = math.tanh %172 : vector<8x32xf32>
    %174 = arith.mulf %169, %173 : vector<8x32xf32>
    %c7_i32 = arith.constant 7 : i32
    %175 = arith.index_cast %c7_i32 : i32 to index
    %c0_44 = arith.constant 0 : index
    %c0_45 = arith.constant 0 : index
    %176 = vector.load %arg9[%175, %c0_44, %c0_45] : memref<8x8x128xf32, #tpu.memory_space<vmem>>, vector<1x8x128xf32>
    %177 = vector.shape_cast %176 : vector<1x8x128xf32> to vector<8x128xf32>
    %cst_46 = arith.constant dense<0.000000e+00> : vector<8x128xf32>
    %178 = tpu.matmul %174, %25, %cst_46 {dimension_numbers = #tpu.dot_dimension_numbers<[1], [0], [0], [1], [0, 0, 1, 1], [], []>} : vector<8x32xf32>, vector<32x128xf32>, vector<8x128xf32> -> vector<8x128xf32>
    %179 = arith.addf %177, %178 : vector<8x128xf32>
    %180 = vector.extract_strided_slice %179 {offsets = [0, 0], sizes = [8, 96], strides = [1, 1]} : vector<8x128xf32> to vector<8x96xf32>
    %181 = arith.negf %180 : vector<8x96xf32>
    %182 = math.exp %181 : vector<8x96xf32>
    %cst_47 = arith.constant 1.000000e+00 : f32
    %183 = vector.broadcast %cst_47 : f32 to vector<8x96xf32>
    %184 = arith.addf %183, %182 : vector<8x96xf32>
    %185 = arith.divf %183, %184 : vector<8x96xf32>
    %186 = vector.extract_strided_slice %179 {offsets = [0, 96], sizes = [8, 32], strides = [1, 1]} : vector<8x128xf32> to vector<8x32xf32>
    %187 = math.tanh %186 : vector<8x32xf32>
    %188 = vector.extract_strided_slice %185 {offsets = [0, 0], sizes = [8, 32], strides = [1, 1]} : vector<8x96xf32> to vector<8x32xf32>
    %189 = vector.extract_strided_slice %185 {offsets = [0, 32], sizes = [8, 32], strides = [1, 1]} : vector<8x96xf32> to vector<8x32xf32>
    %190 = vector.extract_strided_slice %185 {offsets = [0, 64], sizes = [8, 32], strides = [1, 1]} : vector<8x96xf32> to vector<8x32xf32>
    %191 = arith.mulf %189, %172 : vector<8x32xf32>
    %192 = arith.mulf %188, %187 : vector<8x32xf32>
    %193 = arith.addf %191, %192 : vector<8x32xf32>
    %194 = math.tanh %193 : vector<8x32xf32>
    %195 = arith.mulf %190, %194 : vector<8x32xf32>
    %c8_i32 = arith.constant 8 : i32
    %c0_48 = arith.constant 0 : index
    %c0_49 = arith.constant 0 : index
    %196 = vector.load %arg10[%c0_48, %c0_49] : memref<8x32xf32, #tpu.memory_space<vmem>>, vector<8x32xf32>
    tpu.vector_store %arg10[%c0_48, %c0_49], %195 {strides = array<i32>} : memref<8x32xf32, #tpu.memory_space<vmem>>, vector<8x32xf32>,
    %c0_50 = arith.constant 0 : index
    %c0_51 = arith.constant 0 : index
    %197 = vector.load %arg11[%c0_50, %c0_51] : memref<8x32xf32, #tpu.memory_space<vmem>>, vector<8x32xf32>
    tpu.vector_store %arg11[%c0_50, %c0_51], %193 {strides = array<i32>} : memref<8x32xf32, #tpu.memory_space<vmem>>, vector<8x32xf32>,
    %c0_i32_52 = arith.constant 0 : i32
    %198 = arith.cmpi eq, %arg1, %c0_i32_52 : i32
    %199 = arith.extui %198 : i1 to i32
    %c0_i32_53 = arith.constant 0 : i32
    %200 = arith.cmpi ne, %199, %c0_i32_53 : i32
    scf.if %200 {
      %c0_54 = arith.constant 0 : index
      %c0_55 = arith.constant 0 : index
      %201 = vector.load %arg10[%c0_54, %c0_55] : memref<8x32xf32, #tpu.memory_space<vmem>>, vector<8x32xf32>
      %c0_56 = arith.constant 0 : index
      %c0_57 = arith.constant 0 : index
      %202 = vector.load %arg6[%c0_56, %c0_57] : memref<32x2xf32, #tpu.memory_space<vmem>>, vector<32x2xf32>
      %cst_58 = arith.constant dense<0.000000e+00> : vector<8x2xf32>
      %203 = tpu.matmul %201, %202, %cst_58 {dimension_numbers = #tpu.dot_dimension_numbers<[1], [0], [0], [1], [0, 0, 1, 1], [], []>} : vector<8x32xf32>, vector<32x2xf32>, vector<8x2xf32> -> vector<8x2xf32>
      %c0_59 = arith.constant 0 : index
      %c0_60 = arith.constant 0 : index
      %204 = vector.load %arg7[%c0_59, %c0_60] : memref<1x2xf32, #tpu.memory_space<vmem>>, vector<1x2xf32>
      %205 = vector.broadcast %204 : vector<1x2xf32> to vector<8x2xf32>
      %206 = arith.addf %203, %205 : vector<8x2xf32>
      %c0_61 = arith.constant 0 : index
      %c0_62 = arith.constant 0 : index
      %207 = vector.load %arg8[%c0_61, %c0_62] : memref<8x2xf32, #tpu.memory_space<vmem>>, vector<8x2xf32>
      tpu.vector_store %arg8[%c0_61, %c0_62], %206 {strides = array<i32>} : memref<8x2xf32, #tpu.memory_space<vmem>>, vector<8x2xf32>,
    } else {
    }
    return
  }
  func.func @transform_0(%arg0: i32, %arg1: i32) -> (i32, i32, i32) {
    %c0_i32 = arith.constant 0 : i32
    %c0_i32_0 = arith.constant 0 : i32
    return %arg1, %arg0, %c0_i32 : i32, i32, i32
  }
  func.func @transform_1(%arg0: i32, %arg1: i32) -> (i32, i32) {
    %c0_i32 = arith.constant 0 : i32
    %c0_i32_0 = arith.constant 0 : i32
    %c0_i32_1 = arith.constant 0 : i32
    return %c0_i32, %c0_i32_0 : i32, i32
  }
  func.func @transform_2(%arg0: i32, %arg1: i32) -> (i32, i32) {
    %c0_i32 = arith.constant 0 : i32
    %c0_i32_0 = arith.constant 0 : i32
    %c0_i32_1 = arith.constant 0 : i32
    return %c0_i32, %c0_i32_0 : i32, i32
  }
  func.func @transform_3(%arg0: i32, %arg1: i32) -> (i32, i32) {
    %c0_i32 = arith.constant 0 : i32
    %c0_i32_0 = arith.constant 0 : i32
    %c0_i32_1 = arith.constant 0 : i32
    return %c0_i32, %c0_i32_0 : i32, i32
  }
  func.func @transform_4(%arg0: i32, %arg1: i32) -> (i32, i32) {
    %c0_i32 = arith.constant 0 : i32
    %c0_i32_0 = arith.constant 0 : i32
    %c0_i32_1 = arith.constant 0 : i32
    return %c0_i32, %c0_i32_0 : i32, i32
  }
  func.func @transform_5(%arg0: i32, %arg1: i32) -> (i32, i32) {
    %c0_i32 = arith.constant 0 : i32
    %c0_i32_0 = arith.constant 0 : i32
    %c0_i32_1 = arith.constant 0 : i32
    return %c0_i32, %c0_i32_0 : i32, i32
  }
  func.func @transform_6(%arg0: i32, %arg1: i32) -> (i32, i32) {
    %c0_i32 = arith.constant 0 : i32
    %c0_i32_0 = arith.constant 0 : i32
    return %arg0, %c0_i32 : i32, i32
  }
}

</mosaic_0001>

<bundles_post_ra>
// kernel: tpu_custom_call.1
= control target key start
LH: loop header
LB: loop body
LE: loop exit
PB: predicated region body
PF: predicated region fallthrough
CT: control target
= control target key end

     0   :  { %vm27_vm0 = vcmask 261120   ;;  %v1400_v0 = vmov 0.0|0.0   ;;  %vm1401_vm1 = vmmov 0   ;;  %v1402_v4 = vmov 0.0   ;;  %s1406_s11 = smov 64   ;;  %s1654_s2 = inlined_call_operand.vmem [shape: f32[32,128], index: 2, kind: input, shape index: {}]   ;;  %s1655_s0 = inlined_call_operand.vmem [shape: f32[8,8,2], index: 0, kind: input, shape index: {}]   ;;  %s1656_s1 = inlined_call_operand.vmem [shape: f32[2,128], index: 1, kind: input, shape index: {}]   ;;  %s1657_s3 = inlined_call_operand.vmem [shape: f32[1,128], index: 3, kind: input, shape index: {}]   ;;  %s1658_s4 = inlined_call_operand.vmem [shape: f32[32,2], index: 4, kind: input, shape index: {}]   ;;  %s1659_s5 = inlined_call_operand.vmem [shape: f32[1,2], index: 5, kind: input, shape index: {}]   ;;  %s1660_s6 = inlined_call_operand.vmem [shape: f32[8,2], index: 6, kind: output, shape index: {}]  }
   0x1   :  { %1257 = vmatprep.subr.bf16.mxu0 %v1400_v0  ;;  %v166_v1 = vld [vmem:[%s1654_s2] sm:$0xff]  ;;  %v167_v2 = vld [vmem:[%s1654_s2 + $0x8] sm:$0xff]  ;;  %v168_v3 = vld [vmem:[%s1654_s2 + $0x10] sm:$0xff]  ;;  %1166 = vmatprep.mubr.msk.f32.mxu0 %vm1401_vm1, %v1402_v4  ;;  %28 = vst.msk [vmem:[#allocation3] sm:$0xff] %vm27_vm0, %v1402_v4  ;;  %v1403_v7 = vmov 0   ;;  %v1404_v10 = vmov 1   ;;  %v80_v12 = vlaneseq }
   0x2   :  { %29 = vst.msk [vmem:[#allocation4] sm:$0xff] %vm27_vm0, %v1402_v4  ;;  %v1459_v5 = vpack.c.bf16 %v167_v2, %v166_v1  ;;  %v169_v6 = vld [vmem:[%s1654_s2 + $0x18] sm:$0xff]  ;;  %1319 = vset.pattern.permute.xlu0 %v1403_v7  ;;  %v30_v8 = vld [vmem:[%s1655_s0] sm:$0xff]  ;;  %1263 = vmatprep.subr.bf16.mxu1 %v1400_v0  ;;  %v31_v42 = vld [vmem:[%s1655_s0 + $0x8] sm:$0xff]  ;;  %vm1088_vm2 = vcmask 15360  }
   0x3   :  { %42 = vperm.xlu0 %1319, %v30_v8   ;;  %1177 = vmatprep.mubr.msk.f32.mxu1 %vm1401_vm1, %v1402_v4  ;;  %v1472_v9 = vpack.c.bf16 %v169_v6, %v168_v3  ;;  %v81_v13 = vshrl.u32 %v80_v12, 7  ;;  %v38_v15 = vld [vmem:[%s1656_s1] sm:$0x3]  ;;  %s1405_s1 = smov 32   ;;  %v32_v3 = vld [vmem:[%s1655_s0 + $0x10] sm:$0xff] }
   0x4   :  { %1259 = vmatpush3.bf16.msra.mxu0 %v1459_v5  ;;  %1265 = vmatpush3.bf16.msra.mxu1 %v1459_v5  ;;  %v1502_v21 = vld [vmem:[%s1657_s3] ss:$0 sm:$0xff] }
   0x5   :  { %1260 = vmatprep.subr.bf16.mxu0 %v1400_v0  ;;  %1266 = vmatprep.subr.bf16.mxu1 %v1400_v0  ;;  %v82_v14 = vsub.s32 0, %v81_v13  ;;  %v140_v18 = vsub.s32 1, %v81_v13 }
   0x6   :  { %1322 = vset.pattern.permute.xlu1 %v1404_v10 }
   0x7   :  { %1320 = vset.pattern.permute.xlu0 %v1404_v10  ;;  %v1494_v17 = vrot.slane %v38_v15, %v82_v14  ;;  %v1497_v20 = vrot.slane %v38_v15, %v140_v18 }
   0x8   :  { %1262 = vmatpush3.bf16.msra.mxu0 %v1472_v9  ;;  %v170_v11 = vld [vmem:[#allocation3] sm:$0xff]  ;;  %107 = vperm.xlu0 %1320, %v30_v8  }
   0x9   :  { %1268 = vmatpush3.bf16.msra.mxu1 %v1472_v9  ;;  %1269 = vmatprep.subr.bf16.mxu0 %v1400_v0  ;;  %v171_v30 = vld [vmem:[#allocation4] sm:$0xff] }
   0xa   :  { %1275 = vmatprep.subr.bf16.mxu1 %v1400_v0 }
   0xb   :  { %1167 = vmatmul.mubr.msk.f32.vlgmr.msra.gmra.mrb[0].mxu0 %vm27_vm0, %v170_v11 }
   0xc   :  { %1321 = vset.pattern.permute.xlu0 %v1403_v7  ;;  %1271 = vmatpush3.bf16.msra.mxu0 %v1459_v5 }
   0xd   :  { %1272 = vmatprep.subr.bf16.mxu0 %v1400_v0  ;;  %1188 = vmatprep.mubr.msk.f32.mxu0 %vm1401_vm1, %v1402_v4 }
  0x10   :  { %1274 = vmatpush3.bf16.msra.mxu0 %v1472_v9 }
  0x11   :  { %1281 = vmatprep.subr.bf16.mxu0 %v1400_v0 }
  0x82   :  { %v43_v16 = vpop.permute.xlu0 %42 }
  0x83   :  { %v84_v19 = vmul.f32 %v1494_v17, %v43_v16 }
  0x85   :  { %v98_v23 = vadd.f32 %v1502_v21, %v84_v19 }
  0x87   :  { %v108_v22 = vpop.permute.xlu0 %107 }
  0x88   :  { %v142_v24 = vmul.f32 %v1497_v20, %v108_v22 }
  0x8a   :  { %v150_v25 = vadd.f32 %v142_v24, %v98_v23 }
  0xde   :  { %v243_v26 = vpop.f32.mrb[0].mxu0 }
  0xdf   :  { %v247_v27 = vadd.f32 %v243_v26, %v150_v25  ;;  %v1168_v28 = vpop.f32.mrb[1].mxu0 }
  0xe1   :  { %1336 = vtanh.f32 %v247_v27  ;;  %v1096_v31 = vmul.f32 -1.442695, %v247_v27 }
  0xe3   :  { %1338 = vpow2.f32 %v1096_v31 }
  0xeb   :  { %v1337_v29 = vpop.eup %1336 }
  0xec   :  { %261 = vrot.lane.b32.xlu1 %v1337_v29, %s1405_s1 }
  0xed   :  { %v1339_v32 = vpop.eup %1338 }
  0xee   :  { %v251_v33 = vadd.f32 1.0, %v1339_v32 }
  0xf0   :  { %256 = vrot.lane.b32.xlu1 %v171_v30, %s1405_s1  ;;  %1340 = vrcp.f32 %v251_v33 }
  0xfa   :  { %v1341_v34 = vpop.eup %1340 }
 0x15e   :  { %v262_v35 = vpop.permute.xlu1 %261 }
 0x15f   :  { %v264_v36 = vmul.f32 %v1341_v34, %v262_v35  ;;  %v33_v35 = vld [vmem:[%s1655_s0 + $0x18] sm:$0xff] }
 0x161   :  { %266 = vrot.lane.b32.xlu1 %v264_v36, %s1405_s1 }
 0x162   :  { %v257_v37 = vpop.permute.xlu1 %256 }
 0x163   :  { %v259_v38 = vmul.f32 %v1341_v34, %v257_v37 }
 0x1d3   :  { %v267_v39 = vpop.permute.xlu1 %266 }
 0x1d4   :  { %v269_v40 = vadd.f32 %v267_v39, %v259_v38 }
 0x1d6   :  { %1342 = vtanh.f32 %v269_v40 }
 0x1e0   :  { %v1343_v41 = vpop.eup %1342 }
 0x1e1   :  { %272 = vrot.lane.b32.xlu0 %v1343_v41, %s1405_s1 }
 0x1e5   :  { %47 = vperm.xlu0 %1321, %v31_v42  }
 0x1e9   :  { %1324 = vset.pattern.permute.xlu0 %v1404_v10 }
 0x253   :  { %v273_v43 = vpop.permute.xlu0 %272 }
 0x254   :  { %v275_v44 = vmul.f32 %v1341_v34, %v273_v43 }
 0x256   :  { %279 = vrot.lane.b32.xlu1 %v275_v44, %s1406_s11 }
 0x25a   :  { %111 = vperm.xlu1 %1322, %v31_v42  }
 0x25e   :  { %1323 = vset.pattern.permute.xlu1 %v1403_v7 }
 0x264   :  { %v48_v46 = vpop.permute.xlu0 %47 }
 0x265   :  { %v85_v47 = vmul.f32 %v1494_v17, %v48_v46 }
 0x267   :  { %v99_v49 = vadd.f32 %v1502_v21, %v85_v47 }
 0x2c8   :  { %v280_v45 = vpop.permute.xlu1 %279 }
 0x2c9   :  { %1178 = vmatmul.mubr.msk.f32.vlgmr.msra.gmra.mrb[0].mxu1 %vm27_vm0, %v280_v45 }
 0x2ca   :  { %1277 = vmatpush3.bf16.msra.mxu1 %v1459_v5  ;;  %1199 = vmatprep.mubr.msk.f32.mxu1 %vm1401_vm1, %v1402_v4 }
 0x2cb   :  { %1278 = vmatprep.subr.bf16.mxu1 %v1400_v0 }
 0x2ce   :  { %1280 = vmatpush3.bf16.msra.mxu1 %v1472_v9 }
 0x2cf   :  { %1287 = vmatprep.subr.bf16.mxu1 %v1400_v0 }
 0x2d9   :  { %v112_v48 = vpop.permute.xlu1 %111 }
 0x2da   :  { %v143_v50 = vmul.f32 %v1497_v20, %v112_v48 }
 0x2dc   :  { %v151_v51 = vadd.f32 %v143_v50, %v99_v49 }
 0x39c   :  { %v349_v52 = vpop.f32.mrb[0].mxu1 }
 0x39d   :  { %v353_v53 = vadd.f32 %v349_v52, %v151_v51  ;;  %v1179_v54 = vpop.f32.mrb[1].mxu1 }
 0x39f   :  { %1344 = vtanh.f32 %v353_v53  ;;  %v1098_v56 = vmul.f32 -1.442695, %v353_v53 }
 0x3a1   :  { %1346 = vpow2.f32 %v1098_v56 }
 0x3a9   :  { %v1345_v55 = vpop.eup %1344 }
 0x3aa   :  { %363 = vrot.lane.b32.xlu1 %v1345_v55, %s1405_s1 }
 0x3ab   :  { %v1347_v57 = vpop.eup %1346 }
 0x3ac   :  { %v357_v58 = vadd.f32 1.0, %v1347_v57 }
 0x3ae   :  { %1348 = vrcp.f32 %v357_v58 }
 0x3b8   :  { %v1349_v59 = vpop.eup %1348 }
 0x3b9   :  { %v361_v62 = vmul.f32 %v1349_v59, %v269_v40 }
 0x41c   :  { %v364_v60 = vpop.permute.xlu1 %363 }
 0x41d   :  { %v366_v61 = vmul.f32 %v1349_v59, %v364_v60 }
 0x41f   :  { %368 = vrot.lane.b32.xlu0 %v366_v61, %s1405_s1 }
 0x491   :  { %v369_v63 = vpop.permute.xlu0 %368 }
 0x492   :  { %v371_v1 = vadd.f32 %v369_v63, %v361_v62 }
 0x494   :  { %1350 = vtanh.f32 %v371_v1 }
 0x49e   :  { %v1351_v2 = vpop.eup %1350 }
 0x49f   :  { %374 = vrot.lane.b32.xlu1 %v1351_v2, %s1405_s1 }
 0x4a3   :  { %52 = vperm.xlu1 %1323, %v32_v3  }
 0x4a7   :  { %1326 = vset.pattern.permute.xlu1 %v1404_v10 }
 0x511   :  { %v375_v6 = vpop.permute.xlu1 %374 }
 0x512   :  { %v377_v8 = vmul.f32 %v1349_v59, %v375_v6  ;;  %v34_v59 = vld [vmem:[%s1655_s0 + $0x20] sm:$0xff] }
 0x514   :  { %381 = vrot.lane.b32.xlu0 %v377_v8, %s1406_s11 }
 0x518   :  { %115 = vperm.xlu0 %1324, %v32_v3  }
 0x51c   :  { %1325 = vset.pattern.permute.xlu0 %v1403_v7 }
 0x522   :  { %v53_v12 = vpop.permute.xlu1 %52 }
 0x523   :  { %v86_v13 = vmul.f32 %v1494_v17, %v53_v12 }
 0x525   :  { %v100_v15 = vadd.f32 %v1502_v21, %v86_v13 }
 0x586   :  { %v382_v11 = vpop.permute.xlu0 %381 }
 0x587   :  { %1189 = vmatmul.mubr.msk.f32.vlgmr.msra.gmra.mrb[2].mxu0 %vm27_vm0, %v382_v11 }
 0x588   :  { %1283 = vmatpush3.bf16.msra.mxu0 %v1459_v5  ;;  %1210 = vmatprep.mubr.msk.f32.mxu0 %vm1401_vm1, %v1402_v4 }
 0x589   :  { %1284 = vmatprep.subr.bf16.mxu0 %v1400_v0 }
 0x58c   :  { %1286 = vmatpush3.bf16.msra.mxu0 %v1472_v9 }
 0x58d   :  { %1293 = vmatprep.subr.bf16.mxu0 %v1400_v0 }
 0x597   :  { %v116_v14 = vpop.permute.xlu0 %115 }
 0x598   :  { %v144_v16 = vmul.f32 %v1497_v20, %v116_v14 }
 0x59a   :  { %v152_v18 = vadd.f32 %v144_v16, %v100_v15 }
 0x65a   :  { %v451_v19 = vpop.f32.mrb[2].mxu0 }
 0x65b   :  { %v455_v22 = vadd.f32 %v451_v19, %v152_v18  ;;  %v1190_v23 = vpop.f32.mrb[3].mxu0 }
 0x65d   :  { %1352 = vtanh.f32 %v455_v22  ;;  %v1100_v25 = vmul.f32 -1.442695, %v455_v22 }
 0x65f   :  { %1354 = vpow2.f32 %v1100_v25 }
 0x667   :  { %v1353_v24 = vpop.eup %1352 }
 0x668   :  { %465 = vrot.lane.b32.xlu1 %v1353_v24, %s1405_s1 }
 0x669   :  { %v1355_v26 = vpop.eup %1354 }
 0x66a   :  { %v459_v27 = vadd.f32 1.0, %v1355_v26 }
 0x66c   :  { %1356 = vrcp.f32 %v459_v27 }
 0x676   :  { %v1357_v28 = vpop.eup %1356 }
 0x677   :  { %v463_v31 = vmul.f32 %v1357_v28, %v371_v1 }
 0x6da   :  { %v466_v29 = vpop.permute.xlu1 %465 }
 0x6db   :  { %v468_v30 = vmul.f32 %v1357_v28, %v466_v29 }
 0x6dd   :  { %470 = vrot.lane.b32.xlu1 %v468_v30, %s1405_s1 }
 0x74f   :  { %v471_v32 = vpop.permute.xlu1 %470 }
 0x750   :  { %v473_v33 = vadd.f32 %v471_v32, %v463_v31 }
 0x752   :  { %1358 = vtanh.f32 %v473_v33 }
 0x75c   :  { %v1359_v34 = vpop.eup %1358 }
 0x75d   :  { %476 = vrot.lane.b32.xlu0 %v1359_v34, %s1405_s1 }
 0x761   :  { %57 = vperm.xlu0 %1325, %v33_v35  }
 0x765   :  { %1328 = vset.pattern.permute.xlu0 %v1404_v10 }
 0x7cf   :  { %v477_v36 = vpop.permute.xlu0 %476 }
 0x7d0   :  { %v479_v37 = vmul.f32 %v1357_v28, %v477_v36  ;;  %v35_v28 = vld [vmem:[%s1655_s0 + $0x28] sm:$0xff] }
 0x7d2   :  { %483 = vrot.lane.b32.xlu1 %v479_v37, %s1406_s11 }
 0x7d6   :  { %119 = vperm.xlu1 %1326, %v33_v35  }
 0x7da   :  { %1327 = vset.pattern.permute.xlu1 %v1403_v7 }
 0x7e0   :  { %v58_v39 = vpop.permute.xlu0 %57 }
 0x7e1   :  { %v87_v40 = vmul.f32 %v1494_v17, %v58_v39 }
 0x7e3   :  { %v101_v42 = vadd.f32 %v1502_v21, %v87_v40 }
 0x844   :  { %v484_v38 = vpop.permute.xlu1 %483 }
 0x845   :  { %1200 = vmatmul.mubr.msk.f32.vlgmr.msra.gmra.mrb[2].mxu1 %vm27_vm0, %v484_v38 }
 0x846   :  { %1289 = vmatpush3.bf16.msra.mxu1 %v1459_v5  ;;  %1221 = vmatprep.mubr.msk.f32.mxu1 %vm1401_vm1, %v1402_v4 }
 0x847   :  { %1290 = vmatprep.subr.bf16.mxu1 %v1400_v0 }
 0x84a   :  { %1292 = vmatpush3.bf16.msra.mxu1 %v1472_v9 }
 0x84b   :  { %1299 = vmatprep.subr.bf16.mxu1 %v1400_v0 }
 0x855   :  { %v120_v41 = vpop.permute.xlu1 %119 }
 0x856   :  { %v145_v43 = vmul.f32 %v1497_v20, %v120_v41 }
 0x858   :  { %v153_v44 = vadd.f32 %v145_v43, %v101_v42 }
 0x918   :  { %v553_v45 = vpop.f32.mrb[2].mxu1 }
 0x919   :  { %v557_v46 = vadd.f32 %v553_v45, %v153_v44  ;;  %v1201_v47 = vpop.f32.mrb[3].mxu1 }
 0x91b   :  { %1360 = vtanh.f32 %v557_v46  ;;  %v1102_v49 = vmul.f32 -1.442695, %v557_v46 }
 0x91d   :  { %1362 = vpow2.f32 %v1102_v49 }
 0x925   :  { %v1361_v48 = vpop.eup %1360 }
 0x926   :  { %567 = vrot.lane.b32.xlu1 %v1361_v48, %s1405_s1 }
 0x927   :  { %v1363_v50 = vpop.eup %1362 }
 0x928   :  { %v561_v51 = vadd.f32 1.0, %v1363_v50  ;;  %v36_v50 = vld [vmem:[%s1655_s0 + $0x30] sm:$0xff] }
 0x92a   :  { %1364 = vrcp.f32 %v561_v51 }
 0x934   :  { %v1365_v52 = vpop.eup %1364 }
 0x935   :  { %v565_v55 = vmul.f32 %v1365_v52, %v473_v33 }
 0x998   :  { %v568_v53 = vpop.permute.xlu1 %567 }
 0x999   :  { %v570_v54 = vmul.f32 %v1365_v52, %v568_v53 }
 0x99b   :  { %572 = vrot.lane.b32.xlu0 %v570_v54, %s1405_s1 }
 0xa0d   :  { %v573_v56 = vpop.permute.xlu0 %572 }
 0xa0e   :  { %v575_v57 = vadd.f32 %v573_v56, %v565_v55 }
 0xa10   :  { %1366 = vtanh.f32 %v575_v57 }
 0xa1a   :  { %v1367_v58 = vpop.eup %1366 }
 0xa1b   :  { %578 = vrot.lane.b32.xlu1 %v1367_v58, %s1405_s1 }
 0xa1f   :  { %62 = vperm.xlu1 %1327, %v34_v59  }
 0xa23   :  { %1330 = vset.pattern.permute.xlu1 %v1404_v10 }
 0xa8d   :  { %v579_v60 = vpop.permute.xlu1 %578 }
 0xa8e   :  { %v581_v61 = vmul.f32 %v1365_v52, %v579_v60 }
 0xa90   :  { %585 = vrot.lane.b32.xlu0 %v581_v61, %s1406_s11 }
 0xa94   :  { %123 = vperm.xlu0 %1328, %v34_v59  }
 0xa98   :  { %1329 = vset.pattern.permute.xlu0 %v1403_v7 }
 0xa9e   :  { %v63_v63 = vpop.permute.xlu1 %62 }
 0xa9f   :  { %v88_v1 = vmul.f32 %v1494_v17, %v63_v63 }
 0xaa1   :  { %v102_v3 = vadd.f32 %v1502_v21, %v88_v1 }
 0xb02   :  { %v586_v62 = vpop.permute.xlu0 %585 }
 0xb03   :  { %1211 = vmatmul.mubr.msk.f32.vlgmr.msra.gmra.mrb[4].mxu0 %vm27_vm0, %v586_v62 }
 0xb04   :  { %1295 = vmatpush3.bf16.msra.mxu0 %v1459_v5  ;;  %1232 = vmatprep.mubr.msk.f32.mxu0 %vm1401_vm1, %v1402_v4 }
 0xb05   :  { %1296 = vmatprep.subr.bf16.mxu0 %v1400_v0 }
 0xb08   :  { %1298 = vmatpush3.bf16.msra.mxu0 %v1472_v9 }
 0xb09   :  { %1305 = vmatprep.subr.bf16.mxu0 %v1400_v0 }
 0xb13   :  { %v124_v2 = vpop.permute.xlu0 %123 }
 0xb14   :  { %v146_v6 = vmul.f32 %v1497_v20, %v124_v2 }
 0xb16   :  { %v154_v8 = vadd.f32 %v146_v6, %v102_v3 }
 0xbd6   :  { %v655_v11 = vpop.f32.mrb[4].mxu0 }
 0xbd7   :  { %v659_v12 = vadd.f32 %v655_v11, %v154_v8  ;;  %v1212_v13 = vpop.f32.mrb[5].mxu0 }
 0xbd9   :  { %1368 = vtanh.f32 %v659_v12  ;;  %v1104_v15 = vmul.f32 -1.442695, %v659_v12 }
 0xbdb   :  { %1370 = vpow2.f32 %v1104_v15 }
 0xbe3   :  { %v1369_v14 = vpop.eup %1368 }
 0xbe4   :  { %669 = vrot.lane.b32.xlu1 %v1369_v14, %s1405_s1  ;;  %v37_v14 = vld [vmem:[%s1655_s0 + $0x38] sm:$0xff]  ;;  %s1407_s0 = smov 96  }
 0xbe5   :  { %v1371_v16 = vpop.eup %1370 }
 0xbe6   :  { %v663_v18 = vadd.f32 1.0, %v1371_v16 }
 0xbe8   :  { %1372 = vrcp.f32 %v663_v18 }
 0xbf2   :  { %v1373_v19 = vpop.eup %1372 }
 0xbf3   :  { %v667_v24 = vmul.f32 %v1373_v19, %v575_v57 }
 0xc56   :  { %v670_v22 = vpop.permute.xlu1 %669 }
 0xc57   :  { %v672_v23 = vmul.f32 %v1373_v19, %v670_v22 }
 0xc59   :  { %674 = vrot.lane.b32.xlu1 %v672_v23, %s1405_s1 }
 0xccb   :  { %v675_v25 = vpop.permute.xlu1 %674 }
 0xccc   :  { %v677_v26 = vadd.f32 %v675_v25, %v667_v24 }
 0xcce   :  { %1374 = vtanh.f32 %v677_v26 }
 0xcd8   :  { %v1375_v27 = vpop.eup %1374 }
 0xcd9   :  { %680 = vrot.lane.b32.xlu0 %v1375_v27, %s1405_s1 }
 0xcdd   :  { %67 = vperm.xlu0 %1329, %v35_v28  }
 0xce1   :  { %1332 = vset.pattern.permute.xlu0 %v1404_v10 }
 0xd4b   :  { %v681_v29 = vpop.permute.xlu0 %680 }
 0xd4c   :  { %v683_v30 = vmul.f32 %v1373_v19, %v681_v29 }
 0xd4e   :  { %687 = vrot.lane.b32.xlu1 %v683_v30, %s1406_s11 }
 0xd52   :  { %127 = vperm.xlu1 %1330, %v35_v28  }
 0xd56   :  { %1331 = vset.pattern.permute.xlu1 %v1403_v7 }
 0xd5c   :  { %v68_v32 = vpop.permute.xlu0 %67 }
 0xd5d   :  { %v89_v33 = vmul.f32 %v1494_v17, %v68_v32 }
 0xd5f   :  { %v103_v35 = vadd.f32 %v1502_v21, %v89_v33 }
 0xdc0   :  { %v688_v31 = vpop.permute.xlu1 %687 }
 0xdc1   :  { %1222 = vmatmul.mubr.msk.f32.vlgmr.msra.gmra.mrb[4].mxu1 %vm27_vm0, %v688_v31 }
 0xdc2   :  { %1301 = vmatpush3.bf16.msra.mxu1 %v1459_v5  ;;  %1243 = vmatprep.mubr.msk.f32.mxu1 %vm1401_vm1, %v1402_v4 }
 0xdc3   :  { %1302 = vmatprep.subr.bf16.mxu1 %v1400_v0 }
 0xdc6   :  { %1304 = vmatpush3.bf16.msra.mxu1 %v1472_v9 }
 0xdd1   :  { %v128_v34 = vpop.permute.xlu1 %127 }
 0xdd2   :  { %v147_v36 = vmul.f32 %v1497_v20, %v128_v34 }
 0xdd4   :  { %v155_v37 = vadd.f32 %v147_v36, %v103_v35 }
 0xe94   :  { %v757_v38 = vpop.f32.mrb[4].mxu1 }
 0xe95   :  { %v761_v39 = vadd.f32 %v757_v38, %v155_v37  ;;  %v1223_v40 = vpop.f32.mrb[5].mxu1  ;;  %v1004_v37 = vld [vmem:[%s1658_s4] sm:$0xff]  ;;  %v1005_v38 = vld [vmem:[%s1658_s4 + $0x8] sm:$0xff] }
 0xe96   :  { %v1006_v40 = vld [vmem:[%s1658_s4 + $0x10] sm:$0xff] }
 0xe97   :  { %1376 = vtanh.f32 %v761_v39  ;;  %v1106_v41 = vmul.f32 -1.442695, %v761_v39  ;;  %v1306_v39 = vpack.c.bf16 %v1005_v38, %v1004_v37 }
 0xe99   :  { %1378 = vpow2.f32 %v1106_v41 }
 0xea1   :  { %v1377_v5 = vpop.eup %1376 }
 0xea2   :  { %771 = vrot.lane.b32.xlu1 %v1377_v5, %s1405_s1  ;;  %v1007_v5 = vld [vmem:[%s1658_s4 + $0x18] sm:$0xff] }
 0xea3   :  { %v1379_v42 = vpop.eup %1378  ;;  %v1309_v41 = vpack.c.bf16 %v1007_v5, %v1006_v40 }
 0xea4   :  { %v765_v9 = vadd.f32 1.0, %v1379_v42 }
 0xea6   :  { %1380 = vrcp.f32 %v765_v9 }
 0xeb0   :  { %v1381_v43 = vpop.eup %1380 }
 0xeb1   :  { %v769_v46 = vmul.f32 %v1381_v43, %v677_v26 }
 0xf14   :  { %v772_v44 = vpop.permute.xlu1 %771 }
 0xf15   :  { %v774_v45 = vmul.f32 %v1381_v43, %v772_v44 }
 0xf17   :  { %776 = vrot.lane.b32.xlu0 %v774_v45, %s1405_s1 }
 0xf89   :  { %v777_v47 = vpop.permute.xlu0 %776 }
 0xf8a   :  { %v779_v48 = vadd.f32 %v777_v47, %v769_v46  ;;  %v1111_v46 = vld [vmem:[%s1659_s5] ss:$0 sm:$0xff] }
 0xf8c   :  { %1382 = vtanh.f32 %v779_v48 }
 0xf96   :  { %v1383_v49 = vpop.eup %1382 }
 0xf97   :  { %782 = vrot.lane.b32.xlu1 %v1383_v49, %s1405_s1 }
 0xf9b   :  { %72 = vperm.xlu1 %1331, %v36_v50  }
 0xf9f   :  { %1334 = vset.pattern.permute.xlu1 %v1404_v10 }
0x1009   :  { %v783_v51 = vpop.permute.xlu1 %782 }
0x100a   :  { %v785_v52 = vmul.f32 %v1381_v43, %v783_v51 }
0x100c   :  { %789 = vrot.lane.b32.xlu0 %v785_v52, %s1406_s11 }
0x1010   :  { %131 = vperm.xlu0 %1332, %v36_v50  }
0x1014   :  { %1333 = vset.pattern.permute.xlu0 %v1403_v7 }
0x101a   :  { %v73_v54 = vpop.permute.xlu1 %72 }
0x101b   :  { %v90_v55 = vmul.f32 %v1494_v17, %v73_v54 }
0x101d   :  { %v104_v57 = vadd.f32 %v1502_v21, %v90_v55 }
0x107e   :  { %v790_v53 = vpop.permute.xlu0 %789 }
0x107f   :  { %1233 = vmatmul.mubr.msk.f32.vlgmr.msra.gmra.mrb[6].mxu0 %vm27_vm0, %v790_v53 }
0x1080   :  { %1254 = vmatprep.mubr.msk.f32.mxu0 %vm1401_vm1, %v1402_v4  ;;  %1307 = vmatpush3.bf16.msra.mxu0 %v1306_v39 }
0x1081   :  { %1308 = vmatprep.subr.bf16.mxu0 %v1400_v0 }
0x1084   :  { %1310 = vmatpush3.bf16.msra.mxu0 %v1309_v41 }
0x108f   :  { %v132_v56 = vpop.permute.xlu0 %131 }
0x1090   :  { %v148_v58 = vmul.f32 %v1497_v20, %v132_v56 }
0x1092   :  { %v156_v59 = vadd.f32 %v148_v58, %v104_v57 }
0x1152   :  { %v859_v60 = vpop.f32.mrb[6].mxu0 }
0x1153   :  { %v863_v61 = vadd.f32 %v859_v60, %v156_v59  ;;  %v1234_v62 = vpop.f32.mrb[7].mxu0 }
0x1155   :  { %1384 = vtanh.f32 %v863_v61  ;;  %v1108_v63 = vmul.f32 -1.442695, %v863_v61 }
0x1157   :  { %1386 = vpow2.f32 %v1108_v63 }
0x115f   :  { %v1385_v7 = vpop.eup %1384 }
0x1160   :  { %873 = vrot.lane.b32.xlu1 %v1385_v7, %s1405_s1 }
0x1161   :  { %v1387_v1 = vpop.eup %1386 }
0x1162   :  { %v867_v4 = vadd.f32 1.0, %v1387_v1 }
0x1164   :  { %1388 = vrcp.f32 %v867_v4 }
0x116e   :  { %v1389_v2 = vpop.eup %1388 }
0x116f   :  { %v871_v8 = vmul.f32 %v1389_v2, %v779_v48 }
0x11d2   :  { %v874_v3 = vpop.permute.xlu1 %873 }
0x11d3   :  { %v876_v6 = vmul.f32 %v1389_v2, %v874_v3 }
0x11d5   :  { %878 = vrot.lane.b32.xlu1 %v876_v6, %s1405_s1 }
0x1247   :  { %v879_v11 = vpop.permute.xlu1 %878 }
0x1248   :  { %v881_v12 = vadd.f32 %v879_v11, %v871_v8 }
0x124a   :  { %1390 = vtanh.f32 %v881_v12 }
0x1254   :  { %v1391_v13 = vpop.eup %1390 }
0x1255   :  { %884 = vrot.lane.b32.xlu0 %v1391_v13, %s1405_s1 }
0x1259   :  { %77 = vperm.xlu0 %1333, %v37_v14  }
0x125d   :  { %1335 = vset.pattern.permute.xlu0 %v1404_v10 }
0x12c7   :  { %v885_v15 = vpop.permute.xlu0 %884 }
0x12c8   :  { %v887_v16 = vmul.f32 %v1389_v2, %v885_v15 }
0x12ca   :  { %891 = vrot.lane.b32.xlu1 %v887_v16, %s1406_s11 }
0x12ce   :  { %135 = vperm.xlu1 %1334, %v37_v14  }
0x12d8   :  { %v78_v19 = vpop.permute.xlu0 %77 }
0x12d9   :  { %v91_v22 = vmul.f32 %v1494_v17, %v78_v19 }
0x12db   :  { %v105_v24 = vadd.f32 %v1502_v21, %v91_v22 }
0x133c   :  { %v892_v18 = vpop.permute.xlu1 %891 }
0x133d   :  { %1244 = vmatmul.mubr.msk.f32.vlgmr.msra.gmra.mrb[6].mxu1 %vm27_vm0, %v892_v18 }
0x134d   :  { %v136_v23 = vpop.permute.xlu1 %135 }
0x134e   :  { %v149_v25 = vmul.f32 %v1497_v20, %v136_v23 }
0x1350   :  { %v157_v26 = vadd.f32 %v149_v25, %v105_v24 }
0x1410   :  { %v961_v27 = vpop.f32.mrb[6].mxu1 }
0x1411   :  { %v965_v28 = vadd.f32 %v961_v27, %v157_v26  ;;  %v1245_v10 = vpop.f32.mrb[7].mxu1 }
0x1413   :  { %1392 = vtanh.f32 %v965_v28  ;;  %v1110_v30 = vmul.f32 -1.442695, %v965_v28 }
0x1415   :  { %1394 = vpow2.f32 %v1110_v30 }
0x141d   :  { %v1393_v29 = vpop.eup %1392 }
0x141e   :  { %975 = vrot.lane.b32.xlu1 %v1393_v29, %s1405_s1 }
0x141f   :  { %v1395_v31 = vpop.eup %1394 }
0x1420   :  { %v969_v32 = vadd.f32 1.0, %v1395_v31 }
0x1422   :  { %1396 = vrcp.f32 %v969_v32 }
0x142c   :  { %v1397_v33 = vpop.eup %1396 }
0x142d   :  { %v973_v21 = vmul.f32 %v1397_v33, %v881_v12 }
0x1490   :  { %v976_v17 = vpop.permute.xlu1 %975 }
0x1491   :  { %v978_v34 = vmul.f32 %v1397_v33, %v976_v17 }
0x1493   :  { %980 = vrot.lane.b32.xlu0 %v978_v34, %s1405_s1 }
0x1505   :  { %v981_v20 = vpop.permute.xlu0 %980 }
0x1506   :  { %v983_v35 = vadd.f32 %v981_v20, %v973_v21 }
0x1508   :  { %1398 = vtanh.f32 %v983_v35 }
0x1512   :  { %v1399_v36 = vpop.eup %1398 }
0x1513   :  { %986 = vrot.lane.b32.xlu1 %v1399_v36, %s1405_s1 }
0x1517   :  { %996 = vrot.lane.b32.xlu1 %v983_v35, %s1407_s0 }
0x1585   :  { %v987_v42 = vpop.permute.xlu1 %986 }
0x1586   :  { %v989_v9 = vmul.f32 %v1397_v33, %v987_v42 }
0x1588   :  { %991 = vrot.lane.b32.xlu0 %v989_v9, %s1406_s11 }
0x1589   :  { %v997_v43 = vpop.permute.xlu1 %996 }
0x158a   :  { %999 = vst.msk [vmem:[#allocation4] sm:$0xff] %vm27_vm0, %v997_v43 }
0x15fa   :  { %v992_v44 = vpop.permute.xlu0 %991 }
0x15fb   :  { %994 = vst.msk [vmem:[#allocation3] sm:$0xff] %vm27_vm0, %v992_v44 }
0x1602   :  { %v1003_v45 = vld [vmem:[#allocation3] sm:$0xff] }
0x1603   :  { %1255 = vmatmul.mubr.msk.f32.vlgmr.msra.gmra.mrb[8].mxu0 %vm27_vm0, %v1003_v45 }
0x16d6   :  { %v1084_v47 = vpop.f32.mrb[8].mxu0 }
0x16d7   :  { %v1085_v0 = vadd.f32 %v1111_v46, %v1084_v47  ;;  %v1256_v48 = vpop.f32.mrb[9].mxu0 }
0x16d9   :  { %1089 = vst.msk [vmem:[%s1660_s6] sm:$0xff] %vm1088_vm2, %v1085_v0 }

</bundles_post_ra>
